<compile_context>
chip_gen: v6e
topology: v6e:2x2x1
jax: 0.10.0
libtpu: 0.0.40
codegen_flags: <defaults>
</compile_context>

<pallas_src>
import functools

import jax
import jax.numpy as jnp
from jax.experimental import pallas as pl
from jax.experimental.pallas import tpu as pltpu

_LANES = 128
_MAX_BLOCK_ROWS = 2048          # 2048*128*4B = 1 MiB per f32 input tile
_EPS = 1e-6


def _icarl_loss_kernel(logit_ref, target_ref, out_ref, acc_ref, *,
                       steps, block_rows, n, needs_mask):
    s = pl.program_id(1)

    # Zero the vector accumulator at the start of each reduction sweep.
    @pl.when(s == 0)
    def _():
        acc_ref[...] = jnp.zeros_like(acc_ref)

    x = logit_ref[...].astype(jnp.float32)
    t = target_ref[...].astype(jnp.float32)
    contrib = t * jnp.log(x + _EPS) + (1.0 - t) * jnp.log(1.0 - x + _EPS)

    if needs_mask:
        # Mask out the <128-element lane pad and any rows of the (possibly
        # partial) edge block that lie beyond the real data. int32 index math
        # is fine up to ~2.1e9 elements.
        blk = pl.program_id(0) * steps + s          # logical block index
        row_ids = jax.lax.broadcasted_iota(jnp.int32, (block_rows, _LANES), 0)
        lane_ids = jax.lax.broadcasted_iota(jnp.int32, (block_rows, _LANES), 1)
        gidx = (blk * block_rows + row_ids) * _LANES + lane_ids
        contrib = jnp.where(gidx < n, contrib, 0.0)

    # Elementwise (VPU-only) accumulation every step.
    acc_ref[...] = acc_ref[...] + contrib

    # Single cross-lane/cross-sublane reduce + negation at the end.
    @pl.when(s == pl.num_programs(1) - 1)
    def _():
        out_ref[...] = jnp.reshape(-jnp.sum(acc_ref[...]), (1, 1, 1))


def icarl_loss(logits, target, *, max_block_rows=_MAX_BLOCK_ROWS):
    """Pallas implementation of iCaRL_loss.forward. Returns a scalar (f32)."""
    assert logits.shape == target.shape
    n = logits.size

    # Keep native floating dtype (bf16 stays bf16 -> half the HBM traffic);
    # only promote non-float inputs so the kernel-side cast is well defined.
    if not jnp.issubdtype(logits.dtype, jnp.floating):
        logits = logits.astype(jnp.float32)
    if not jnp.issubdtype(target.dtype, jnp.floating):
        target = target.astype(jnp.float32)

    flat_x = jnp.ravel(logits)
    flat_t = jnp.ravel(target)

    # Reshape (free) to a lane-dense 2-D slab. Only sizes that are not a
    # multiple of 128 need a tiny (<128 element) pad; the pad is masked
    # in-kernel, so its values are irrelevant.
    rem = n % _LANES
    if rem:
        flat_x = jnp.pad(flat_x, (0, _LANES - rem))
        flat_t = jnp.pad(flat_t, (0, _LANES - rem))
    rows = flat_x.shape[0] // _LANES
    x2d = flat_x.reshape(rows, _LANES)
    t2d = flat_t.reshape(rows, _LANES)

    # Large tiles; a full-array block is always legal when rows is small.
    max_block_rows = max(8, (max_block_rows // 8) * 8)
    block_rows = rows if rows <= max_block_rows else max_block_rows
    total_blocks = pl.cdiv(rows, block_rows)

    # v7x: shard the block range across the 2 TensorCores when it splits
    # evenly (harmless single-core loop on v5e/v6e).
    num_parts = 2 if (total_blocks >= 2 and total_blocks % 2 == 0) else 1
    steps = total_blocks // num_parts

    needs_mask = (total_blocks * block_rows * _LANES) != n

    kernel = functools.partial(
        _icarl_loss_kernel,
        steps=steps, block_rows=block_rows, n=n, needs_mask=needs_mask)

    out = pl.pallas_call(
        kernel,
        out_shape=jax.ShapeDtypeStruct((num_parts, 1, 1), jnp.float32),
        grid_spec=pltpu.PrefetchScalarGridSpec(
            num_scalar_prefetch=0,
            grid=(num_parts, steps),
            in_specs=[
                pl.BlockSpec((block_rows, _LANES),
                             lambda p, s: (p * steps + s, 0)),
                pl.BlockSpec((block_rows, _LANES),
                             lambda p, s: (p * steps + s, 0)),
            ],
            out_specs=pl.BlockSpec((1, 1, 1), lambda p, s: (p, 0, 0)),
            scratch_shapes=[pltpu.VMEM((block_rows, _LANES), jnp.float32)],
        ),
        compiler_params=pltpu.CompilerParams(
            dimension_semantics=("parallel", "arbitrary")),
    )(x2d, t2d)

    return jnp.sum(out)


def _ref_loss(x, t):
    x = x.astype(jnp.float32)
    t = t.astype(jnp.float32)
    return -jnp.sum(t * jnp.log(x + _EPS)
                    + (1.0 - t) * jnp.log(1.0 - x + _EPS))


if __name__ == "__main__":
    key = jax.random.PRNGKey(0)
    k1, k2, k3, k4, k5, k6 = jax.random.split(key, 6)

    # 1) Primary small NCHW case (single big block, no masking).
    logits = jax.nn.sigmoid(jax.random.normal(k1, (2, 4, 16, 16), jnp.float32))
    target = jax.random.bernoulli(k2, p=0.3, shape=(2, 4, 16, 16)).astype(
        jnp.float32)
    loss = icarl_loss(logits, target)
    jax.block_until_ready(loss)
    assert jnp.allclose(loss, _ref_loss(logits, target),
                        rtol=1e-5, atol=1e-4), (loss, _ref_loss(logits, target))

    # 2) Ragged size: exercises the in-kernel tail mask (no big wrapper pad).
    logits2 = jax.nn.sigmoid(jax.random.normal(k3, (3, 5, 7, 11), jnp.float32))
    target2 = jax.random.bernoulli(k4, p=0.5, shape=(3, 5, 7, 11)).astype(
        jnp.float32)
    loss2 = icarl_loss(logits2, target2)
    jax.block_until_ready(loss2)
    assert jnp.allclose(loss2, _ref_loss(logits2, target2),
                        rtol=1e-5, atol=1e-4), (loss2, _ref_loss(logits2, target2))

    # 3) Tiny blocks to exercise the 2-way parallel split (v7x megacore path)
    #    and the multi-step accumulator, still at small shapes.
    loss3 = icarl_loss(logits, target, max_block_rows=8)
    jax.block_until_ready(loss3)
    assert jnp.allclose(loss3, _ref_loss(logits, target),
                        rtol=1e-5, atol=1e-4), (loss3, _ref_loss(logits, target))

    # 4) Multi-block with a partial edge block + mask (odd block count).
    logits4 = jax.nn.sigmoid(jax.random.normal(k5, (2, 4, 18, 16), jnp.float32))
    target4 = jax.random.bernoulli(k6, p=0.4, shape=(2, 4, 18, 16)).astype(
        jnp.float32)
    loss4 = icarl_loss(logits4, target4, max_block_rows=8)
    jax.block_until_ready(loss4)
    assert jnp.allclose(loss4, _ref_loss(logits4, target4),
                        rtol=1e-5, atol=1e-4), (loss4, _ref_loss(logits4, target4))

    # 5) bf16 inputs fed directly (cast happens in-kernel).
    loss5 = icarl_loss(logits.astype(jnp.bfloat16), target.astype(jnp.bfloat16))
    jax.block_until_ready(loss5)
    ref5 = _ref_loss(logits.astype(jnp.bfloat16), target.astype(jnp.bfloat16))
    assert jnp.allclose(loss5, ref5, rtol=1e-4, atol=1e-2), (loss5, ref5)

    print("KERNEL_OK")
</pallas_src>

<mosaic_0001>
module attributes {stable_mosaic.version = 11 : i64} {
  func.func @_icarl_loss_kernel(%arg0: i32, %arg1: i32, %arg2: memref<16x128xf32, #tpu.memory_space<vmem>>, %arg3: memref<16x128xf32, #tpu.memory_space<vmem>>, %arg4: memref<1x1x1xf32, #tpu.memory_space<vmem>>, %arg5: memref<16x128xf32, #tpu.memory_space<vmem>>) attributes {dimension_semantics = [#tpu.dimension_semantics<parallel>, #tpu.dimension_semantics<arbitrary>], iteration_bounds = array<i64: 1, 1>, scalar_prefetch = 0 : i64, scratch_operands = 1 : i64, tpu.core_type = #tpu.core_type<tc>, window_params = [{transform_indices = @transform_0, window_bounds = array<i64: 16, 128>}, {transform_indices = @transform_1, window_bounds = array<i64: 16, 128>}, {transform_indices = @transform_2, window_bounds = array<i64: 1, 1, 1>}]} {
    %c0_i32 = arith.constant 0 : i32
    %0 = arith.cmpi eq, %arg1, %c0_i32 : i32
    %1 = arith.extui %0 : i1 to i32
    %c0_i32_0 = arith.constant 0 : i32
    %2 = arith.cmpi ne, %1, %c0_i32_0 : i32
    scf.if %2 {
      %cst_13 = arith.constant 0.000000e+00 : f32
      %24 = vector.broadcast %cst_13 : f32 to vector<16x128xf32>
      %c0_14 = arith.constant 0 : index
      %c0_15 = arith.constant 0 : index
      %25 = vector.load %arg5[%c0_14, %c0_15] : memref<16x128xf32, #tpu.memory_space<vmem>>, vector<16x128xf32>
      tpu.vector_store %arg5[%c0_14, %c0_15], %24 {strides = array<i32>} : memref<16x128xf32, #tpu.memory_space<vmem>>, vector<16x128xf32>,
    } else {
    }
    %c0 = arith.constant 0 : index
    %c0_1 = arith.constant 0 : index
    %3 = vector.load %arg2[%c0, %c0_1] : memref<16x128xf32, #tpu.memory_space<vmem>>, vector<16x128xf32>
    %c0_2 = arith.constant 0 : index
    %c0_3 = arith.constant 0 : index
    %4 = vector.load %arg3[%c0_2, %c0_3] : memref<16x128xf32, #tpu.memory_space<vmem>>, vector<16x128xf32>
    %cst = arith.constant 9.99999997E-7 : f32
    %5 = vector.broadcast %cst : f32 to vector<16x128xf32>
    %6 = arith.addf %3, %5 : vector<16x128xf32>
    %7 = math.log %6 : vector<16x128xf32>
    %8 = arith.mulf %4, %7 : vector<16x128xf32>
    %cst_4 = arith.constant 1.000000e+00 : f32
    %9 = vector.broadcast %cst_4 : f32 to vector<16x128xf32>
    %10 = arith.subf %9, %4 : vector<16x128xf32>
    %cst_5 = arith.constant 1.000000e+00 : f32
    %11 = vector.broadcast %cst_5 : f32 to vector<16x128xf32>
    %12 = arith.subf %11, %3 : vector<16x128xf32>
    %cst_6 = arith.constant 9.99999997E-7 : f32
    %13 = vector.broadcast %cst_6 : f32 to vector<16x128xf32>
    %14 = arith.addf %12, %13 : vector<16x128xf32>
    %15 = math.log %14 : vector<16x128xf32>
    %16 = arith.mulf %10, %15 : vector<16x128xf32>
    %17 = arith.addf %8, %16 : vector<16x128xf32>
    %c0_7 = arith.constant 0 : index
    %c0_8 = arith.constant 0 : index
    %18 = vector.load %arg5[%c0_7, %c0_8] : memref<16x128xf32, #tpu.memory_space<vmem>>, vector<16x128xf32>
    %19 = arith.addf %18, %17 : vector<16x128xf32>
    %c0_9 = arith.constant 0 : index
    %c0_10 = arith.constant 0 : index
    %20 = vector.load %arg5[%c0_9, %c0_10] : memref<16x128xf32, #tpu.memory_space<vmem>>, vector<16x128xf32>
    tpu.vector_store %arg5[%c0_9, %c0_10], %19 {strides = array<i32>} : memref<16x128xf32, #tpu.memory_space<vmem>>, vector<16x128xf32>,
    %c0_i32_11 = arith.constant 0 : i32
    %21 = arith.cmpi eq, %arg1, %c0_i32_11 : i32
    %22 = arith.extui %21 : i1 to i32
    %c0_i32_12 = arith.constant 0 : i32
    %23 = arith.cmpi ne, %22, %c0_i32_12 : i32
    scf.if %23 {
      %c0_13 = arith.constant 0 : index
      %c0_14 = arith.constant 0 : index
      %24 = vector.load %arg5[%c0_13, %c0_14] : memref<16x128xf32, #tpu.memory_space<vmem>>, vector<16x128xf32>
      %25 = vector.shape_cast %24 : vector<16x128xf32> to vector<1x16x128xf32>
      %cst_15 = arith.constant dense<0.000000e+00> : vector<1xf32>
      %26 = vector.multi_reduction <add>, %25, %cst_15 [1, 2] : vector<1x16x128xf32> to vector<1xf32>
      %27 = vector.shape_cast %26 : vector<1xf32> to vector<1x1x1xf32>
      %28 = vector.extract %27[0, 0, 0] : f32 from vector<1x1x1xf32>
      %cst_16 = arith.constant 0.000000e+00 : f32
      %29 = arith.subf %cst_16, %28 : f32
      %30 = vector.broadcast %29 : f32 to vector<1x1x1xf32>
      %c0_17 = arith.constant 0 : index
      %c0_18 = arith.constant 0 : index
      %c0_19 = arith.constant 0 : index
      %31 = vector.load %arg4[%c0_17, %c0_18, %c0_19] : memref<1x1x1xf32, #tpu.memory_space<vmem>>, vector<1x1x1xf32>
      tpu.vector_store %arg4[%c0_17, %c0_18, %c0_19], %30 {strides = array<i32>} : memref<1x1x1xf32, #tpu.memory_space<vmem>>, vector<1x1x1xf32>,
    } else {
    }
    return
  }
  func.func @transform_0(%arg0: i32, %arg1: i32) -> (i32, i32) {
    %c1_i32 = arith.constant 1 : i32
    %0 = arith.muli %arg0, %c1_i32 : i32
    %1 = arith.addi %0, %arg1 : i32
    %c0_i32 = arith.constant 0 : i32
    %c0_i32_0 = arith.constant 0 : i32
    return %1, %c0_i32 : i32, i32
  }
  func.func @transform_1(%arg0: i32, %arg1: i32) -> (i32, i32) {
    %c1_i32 = arith.constant 1 : i32
    %0 = arith.muli %arg0, %c1_i32 : i32
    %1 = arith.addi %0, %arg1 : i32
    %c0_i32 = arith.constant 0 : i32
    %c0_i32_0 = arith.constant 0 : i32
    return %1, %c0_i32 : i32, i32
  }
  func.func @transform_2(%arg0: i32, %arg1: i32) -> (i32, i32, i32) {
    %c0_i32 = arith.constant 0 : i32
    %c0_i32_0 = arith.constant 0 : i32
    %c0_i32_1 = arith.constant 0 : i32
    return %arg0, %c0_i32, %c0_i32_0 : i32, i32, i32
  }
}

</mosaic_0001>

<bundles_post_ra>
// kernel: tpu_custom_call.1
= control target key start
LH: loop header
LB: loop body
LE: loop exit
PB: predicated region body
PF: predicated region fallthrough
CT: control target
= control target key end

     0   :  { %7 = vsyncpa [#allocation4], 0  ;;  %s235_s0 = inlined_call_operand.hbm [shape: f32[16,128], index: 0, kind: input, shape index: {}]   ;;  %s236_s1 = inlined_call_operand.hbm [shape: f32[16,128], index: 1, kind: input, shape index: {}]   ;;  %s237_s2 = inlined_call_operand.hbm [shape: f32[1,1,1], index: 2, kind: output, shape index: {}]  }
   0x1   :  { %8 = vsyncpa [#allocation7], 0 }
   0x2   :  { %9 = vsyncpa [#allocation5], 0  ;;  %s206_s9 = smov [#allocation3]  }
   0x3   :  { %s19_s10 = sshll.u32 %s206_s9, 4  ;;  %s20_s10 = int_to_ptr.vmem [resolvable:$true] %s19_s10 }
   0x4   :  { %s148_s11 = scalar_lea.vmem %s20_s10, 256  ;;  %p153_p1 = scmp.lt.s32.totalorder %s20_s10, %s20_s10 }
   0x5   :  { %p149_p0 = scmp.ne.s32.totalorder %s20_s10, %s148_s11  ;;  %p154_p2 = scmp.lt.s32.totalorder %s148_s11, %s148_s11 }
   0x7   :  { %p155_p3 = por %p154_p2, %p153_p1 }
   0x9   :  { %p156_p4 = pnand %p155_p3, %p149_p0 }
   0xb   :  { %159 = shalt.err (!%p156_p4)
}
   0xc   :  { %s207_s12 = smov 128   ;;  %s208_s13 = smov 8  }
   0xd   :  { %25 = dma.hbm_to_vmem [thread:$0]  %s235_s0, 256, %s20_s10, [#allocation4], %s207_s12, %s207_s12, %s208_s13  }
   0xe   :  { %s209_s16 = smov [#allocation6]  }
   0xf   :  { %s35_s17 = sshll.u32 %s209_s16, 4  ;;  %s36_s17 = int_to_ptr.vmem [resolvable:$true] %s35_s17 }
  0x10   :  { %s168_s18 = scalar_lea.vmem %s36_s17, 256  ;;  %p173_p6 = scmp.lt.s32.totalorder %s36_s17, %s36_s17 }
  0x11   :  { %p169_p5 = scmp.ne.s32.totalorder %s36_s17, %s168_s18  ;;  %p174_p7 = scmp.lt.s32.totalorder %s168_s18, %s168_s18 }
  0x13   :  { %p175_p8 = por %p174_p7, %p173_p6 }
  0x15   :  { %p176_p9 = pnand %p175_p8, %p169_p5 }
  0x17   :  { %179 = shalt.err (!%p176_p9)
}
  0x18   :  { %41 = dma.hbm_to_vmem [thread:$0]  %s236_s1, 256, %s36_s17, [#allocation7], %s207_s12, %s207_s12, %s208_s13  }
  0x19   :  { %200 = dma.done.wait [#allocation4], 256  }
  0x1a   :  { %201 = vsyncadd [#allocation4], 4294967040 }
  0x1b   :  { %202 = dma.done.wait [#allocation7], 256  }
  0x1c   :  { %203 = vsyncadd [#allocation7], 4294967040  ;;  %v58_v0 = vld [vmem:[#allocation3] sm:$0xff]  ;;  %v59_v1 = vld [vmem:[#allocation3 + $0x8] sm:$0xff]  ;;  %s210_s0 = smov [#allocation8]   ;;  %vm107_vm0 = vcmask 0  }
  0x1d   :  { %v62_v2 = vadd.f32 1e-06, %v58_v0  ;;  %v63_v3 = vadd.f32 1e-06, %v59_v1  ;;  %v72_v4 = vsub.f32 1.0, %v58_v0  ;;  %v73_v5 = vsub.f32 1.0, %v59_v1 }
  0x1e   :  { %v60_v8 = vld [vmem:[#allocation6] sm:$0xff]  ;;  %v61_v10 = vld [vmem:[#allocation6 + $0x8] sm:$0xff]  ;;  %s115_s1 = sshll.u32 %s210_s0, 4  ;;  %s116_s1 = int_to_ptr.vmem [resolvable:$true] %s115_s1 }
  0x1f   :  { %132 = vlog2.f32 %v62_v2  ;;  %v74_v6 = vadd.f32 1e-06, %v72_v4  ;;  %v75_v7 = vadd.f32 1e-06, %v73_v5  ;;  %v70_v14 = vsub.f32 1.0, %v60_v8  ;;  %s180_s23 = scalar_lea.vmem %s116_s1, 16  ;;  %p185_p11 = scmp.lt.s32.totalorder %s116_s1, %s116_s1 }
  0x20   :  { %134 = vlog2.f32 %v63_v3  ;;  %v71_v16 = vsub.f32 1.0, %v61_v10  ;;  %p181_p10 = scmp.ne.s32.totalorder %s116_s1, %s180_s23  ;;  %s184_s24 = scalar_lea.vmem %s116_s1, 32 }
  0x21   :  { %136 = vlog2.f32 %v74_v6  ;;  %p186_p12 = scmp.lt.s32.totalorder %s184_s24, %s180_s23 }
  0x22   :  { %138 = vlog2.f32 %v75_v7 }
  0x23   :  { %p187_p13 = por %p186_p12, %p185_p11 }
  0x25   :  { %p188_p0 = pnand %p187_p13, %p181_p10 }
  0x2c   :  { %v133_v9 = vpop.eup %132 }
  0x2d   :  { %v135_v11 = vpop.eup %134  ;;  %v65_v12 = vmul.f32 0.6931472, %v133_v9 }
  0x2e   :  { %v67_v13 = vmul.f32 0.6931472, %v135_v11  ;;  %v137_v15 = vpop.eup %136 }
  0x2f   :  { %v139_v17 = vpop.eup %138  ;;  %v68_v18 = vmul.f32 %v65_v12, %v60_v8  ;;  %v77_v19 = vmul.f32 0.6931472, %v137_v15 }
  0x30   :  { %v69_v20 = vmul.f32 %v67_v13, %v61_v10  ;;  %v79_v21 = vmul.f32 0.6931472, %v139_v17 }
  0x31   :  { %v80_v22 = vmul.f32 %v77_v19, %v70_v14 }
  0x32   :  { %v81_v23 = vmul.f32 %v79_v21, %v71_v16 }
  0x33   :  { %v82_v24 = vadd.f32 %v80_v22, %v68_v18 }
  0x34   :  { %v83_v25 = vadd.f32 %v81_v23, %v69_v20 }
  0x36   :  { %v95_v26 = vadd.f32 %v83_v25, %v82_v24 }
  0x38   :  { %96 = vadd.xlane.f32.xlu0 %v95_v26 }
  0xc1   :  { %v97_v27 = vpop.xlane.xlu0 %96 }
  0xc2   :  { %v98_v28 = vrot.slane %v97_v27, 4 }
  0xc4   :  { %v99_v29 = vadd.f32 %v98_v28, %v97_v27 }
  0xc6   :  { %v100_v30 = vrot.slane %v99_v29, 2 }
  0xc8   :  { %v101_v31 = vadd.f32 %v100_v30, %v99_v29 }
  0xca   :  { %v102_v32 = vrot.slane %v101_v31, 1 }
  0xcc   :  { %v103_v33 = vadd.f32 %v102_v32, %v101_v31 }
  0xce   :  { %125 = vpush %v103_v33 }
  0xff   :  { %s126_s21 = spop %125 }
 0x100   :  { %s105_s22 = ssub.f32 0.0, %s126_s21 }
 0x102   :  { %v106_v34 = vstv %s105_s22 }
 0x103   :  { %108 = vst.msk [vmem:[#allocation8] sm:$0x1] %vm107_vm0, %v106_v34 }
 0x104   :  { %191 = shalt.err (!%p188_p0)
}
 0x105   :  { %118 = dma.vmem_to_hbm [thread:$0]  %s116_s1, 16, %s237_s2, [#allocation5]  }
 0x106   :  { %204 = dma.done.wait [#allocation5], 16  }
 0x107   :  { %205 = vsyncadd [#allocation5], 4294967280 }
 0x108   :  { %122 = vsyncpa [#allocation4], 1 }
 0x109   :  { %123 = vsyncpa [#allocation7], 1 }
 0x10a   :  { %124 = vsyncpa [#allocation5], 1 }

</bundles_post_ra>
